<compile_context>
chip_gen: v7x
topology: tpu7x:2x2x1
jax: 0.10.0
libtpu: 0.0.40
codegen_flags: <defaults>
</compile_context>

<pallas_src>
import jax
import jax.numpy as jnp
from jax.experimental import pallas as pl
from jax.experimental.pallas import tpu as pltpu


D_IN, H1, H2 = 28 * 28, 512, 256


def disc_kernel(x_ref, w1_ref, w2_ref, w3_ref, bias_ref, out_ref):
    # bias_ref is the packed (1, 769) array: [b1 (512) | b2 (256) | b3 (1)].
    # Slice boundaries (0, 512, 768) are lane-aligned (multiples of 128).
    b1 = bias_ref[:, 0:H1]                       # (1, 512) f32
    b2 = bias_ref[:, H1:H1 + H2]                 # (1, 256) f32
    b3 = bias_ref[:, H1 + H2:]                   # (1, 1)   f32

    # Cast to bf16 inside the kernel (fused with the first matmul) instead of a
    # separate XLA cast pass over x in HBM.
    x = x_ref[...].astype(jnp.bfloat16)                                  # (TB, 784)

    # Layer 1: bf16 MXU matmul, f32 accumulate; bias + LeakyReLU in f32.
    h1 = jnp.dot(x, w1_ref[...], preferred_element_type=jnp.float32) + b1
    h1 = jnp.maximum(h1, 0.2 * h1)               # LeakyReLU(0.2): mul + max

    # Layer 2: bf16 MXU matmul again (f32 accumulate).
    h2 = jnp.dot(h1.astype(jnp.bfloat16), w2_ref[...],
                 preferred_element_type=jnp.float32) + b2                # (TB, 256)
    h2 = jnp.maximum(h2, 0.2 * h2)

    # Layer 3: (TB, 256) @ (256, 1) is a degenerate MXU shape -> VPU multiply
    # against the (1, 256) weight row + cross-lane reduction (XLU).
    z = jnp.sum(h2 * w3_ref[...], axis=-1, keepdims=True) + b3           # (TB, 1)

    out_ref[...] = jax.nn.sigmoid(z)


def init_discriminator_params(key):
    """Deterministic PyTorch-style init: U(-1/sqrt(fan_in), 1/sqrt(fan_in))."""
    dims = [(D_IN, H1), (H1, H2), (H2, 1)]
    params = []
    for i, (fan_in, fan_out) in enumerate(dims):
        kw, kb = jax.random.split(jax.random.fold_in(key, i))
        bound = 1.0 / (fan_in ** 0.5)
        w = jax.random.uniform(kw, (fan_in, fan_out), jnp.float32, -bound, bound)
        b = jax.random.uniform(kb, (1, fan_out), jnp.float32, -bound, bound)
        params += [w, b]
    return tuple(params)


def prepare_discriminator_params(params):
    """Hoisted per-parameter-update prep: bf16 weights, w3 row, packed biases."""
    w1, b1, w2, b2, w3, b3 = params
    w1_bf = w1.astype(jnp.bfloat16)                                      # (784, 512)
    w2_bf = w2.astype(jnp.bfloat16)                                      # (512, 256)
    w3_row = w3.reshape(1, H2).astype(jnp.float32)                       # (1, 256)
    bias = jnp.concatenate(
        [b1.reshape(1, H1), b2.reshape(1, H2), b3.reshape(1, 1)], axis=-1
    ).astype(jnp.float32)                                                # (1, 769)
    return w1_bf, w2_bf, w3_row, bias


def _round_up(x, m):
    return ((x + m - 1) // m) * m


def _choose_batch_tile(b, max_tile):
    """Batch tile: multiple of 16 (bf16 sublane packing), aims for >= 2 grid
    programs (megacore on v7x), prefers a divisor of b so jnp.pad is skipped."""
    target = max(16, min(max_tile, _round_up(-(-b // 2), 16)))
    if b % target == 0:
        return target
    for cand in range(target, 15, -16):
        if b % cand == 0:
            return cand
    return target


def _resident_spec(shape):
    """BlockSpec for a VMEM-resident operand (constant index_map). Single-buffer
    it when the installed JAX supports pipeline_mode."""
    kwargs = {}
    if hasattr(pl, "Buffered"):
        kwargs["pipeline_mode"] = pl.Buffered(1)
    return pl.BlockSpec(shape, lambda i: (0, 0), **kwargs)


def discriminator_forward(x, prepared_params, *, max_tile=1024):
    """x: (B, 1, 28, 28) or (B, 784) float32. prepared_params from
    prepare_discriminator_params(). Returns (B, 1) float32 in [0, 1]."""
    b = x.shape[0]
    x2 = x.reshape(b, D_IN).astype(jnp.float32)   # glue: flatten (view(-1, 784))
    w1_bf, w2_bf, w3_row, bias = prepared_params

    tb = _choose_batch_tile(b, max_tile)
    b_pad = _round_up(b, tb)
    if b_pad != b:
        x2 = jnp.pad(x2, ((0, b_pad - b), (0, 0)))
    grid = (b_pad // tb,)

    out = pl.pallas_call(
        disc_kernel,
        out_shape=jax.ShapeDtypeStruct((b_pad, 1), jnp.float32),
        grid=grid,
        in_specs=[
            pl.BlockSpec((tb, D_IN), lambda i: (i, 0)),    # x: streamed per tile (f32)
            _resident_spec((D_IN, H1)),                    # W1: VMEM-resident bf16
            _resident_spec((H1, H2)),                      # W2: VMEM-resident bf16
            _resident_spec((1, H2)),                       # W3 row: VMEM-resident f32
            _resident_spec((1, H1 + H2 + 1)),              # packed biases f32
        ],
        out_specs=pl.BlockSpec((tb, 1), lambda i: (i, 0)),
        compiler_params=pltpu.CompilerParams(
            dimension_semantics=("parallel",),             # megacore sharding
            vmem_limit_bytes=48 * 1024 * 1024,
        ),
    )(x2, w1_bf, w2_bf, w3_row, bias)

    return out[:b]


def discriminator_reference(x, params):
    """Pure-JAX f32 reference mirroring the PyTorch module."""
    w1, b1, w2, b2, w3, b3 = params
    h = x.reshape(-1, D_IN).astype(jnp.float32)
    h = h @ w1 + b1
    h = jnp.where(h >= 0, h, 0.2 * h)
    h = h @ w2 + b2
    h = jnp.where(h >= 0, h, 0.2 * h)
    z = h @ w3 + b3
    return jax.nn.sigmoid(z)


if __name__ == "__main__":
    key = jax.random.PRNGKey(0)
    k_x, k_p = jax.random.split(key)

    # Small MNIST-like batch, NCHW layout as PyTorch would feed it.
    x = jax.random.normal(k_x, (8, 1, 28, 28), dtype=jnp.float32)
    params = init_discriminator_params(k_p)
    prepared = prepare_discriminator_params(params)   # once per parameter update

    out = discriminator_forward(x, prepared)
    out = jax.block_until_ready(out)

    assert out.shape == (8, 1)
    assert bool(jnp.all(jnp.isfinite(out)))
    assert bool(jnp.all((out >= 0.0) & (out <= 1.0)))

    # Tolerance check against the f32 reference (bf16 matmuls, f32 accumulate).
    ref = discriminator_reference(x, params)
    assert bool(jnp.allclose(out, ref, atol=2e-2, rtol=0.0))

    print("KERNEL_OK")
</pallas_src>

<mosaic_0001>
module attributes {stable_mosaic.version = 11 : i64} {
  func.func @disc_kernel(%arg0: i32, %arg1: memref<16x784xf32, #tpu.memory_space<vmem>>, %arg2: memref<784x512xbf16, #tpu.memory_space<vmem>>, %arg3: memref<512x256xbf16, #tpu.memory_space<vmem>>, %arg4: memref<1x256xf32, #tpu.memory_space<vmem>>, %arg5: memref<1x769xf32, #tpu.memory_space<vmem>>, %arg6: memref<16x1xf32, #tpu.memory_space<vmem>>) attributes {dimension_semantics = [#tpu.dimension_semantics<parallel>], iteration_bounds = array<i64: 1>, scalar_prefetch = 0 : i64, scratch_operands = 0 : i64, tpu.core_type = #tpu.core_type<tc>, window_params = [{transform_indices = @transform_0, window_bounds = array<i64: 16, 784>}, {pipeline_mode = #tpu.pipeline_mode<synchronous>, transform_indices = @transform_1, window_bounds = array<i64: 784, 512>}, {pipeline_mode = #tpu.pipeline_mode<synchronous>, transform_indices = @transform_2, window_bounds = array<i64: 512, 256>}, {pipeline_mode = #tpu.pipeline_mode<synchronous>, transform_indices = @transform_3, window_bounds = array<i64: 1, 256>}, {pipeline_mode = #tpu.pipeline_mode<synchronous>, transform_indices = @transform_4, window_bounds = array<i64: 1, 769>}, {transform_indices = @transform_5, window_bounds = array<i64: 16, 1>}]} {
    %c0 = arith.constant 0 : index
    %c0_0 = arith.constant 0 : index
    %0 = vector.load %arg5[%c0, %c0_0] : memref<1x769xf32, #tpu.memory_space<vmem>>, vector<1x512xf32>
    %c0_1 = arith.constant 0 : index
    %c512 = arith.constant 512 : index
    %1 = vector.load %arg5[%c0_1, %c512] : memref<1x769xf32, #tpu.memory_space<vmem>>, vector<1x256xf32>
    %c0_2 = arith.constant 0 : index
    %c768 = arith.constant 768 : index
    %2 = vector.load %arg5[%c0_2, %c768] : memref<1x769xf32, #tpu.memory_space<vmem>>, vector<1x1xf32>
    %c0_3 = arith.constant 0 : index
    %c0_4 = arith.constant 0 : index
    %3 = vector.load %arg1[%c0_3, %c0_4] : memref<16x784xf32, #tpu.memory_space<vmem>>, vector<16x784xf32>
    %4 = arith.truncf %3 : vector<16x784xf32> to vector<16x784xbf16>
    %c0_5 = arith.constant 0 : index
    %c0_6 = arith.constant 0 : index
    %5 = vector.load %arg2[%c0_5, %c0_6] : memref<784x512xbf16, #tpu.memory_space<vmem>>, vector<784x512xbf16>
    %cst = arith.constant dense<0.000000e+00> : vector<16x512xf32>
    %6 = tpu.matmul %4, %5, %cst {dimension_numbers = #tpu.dot_dimension_numbers<[1], [0], [0], [1], [0, 0, 1, 1], [], []>} : vector<16x784xbf16>, vector<784x512xbf16>, vector<16x512xf32> -> vector<16x512xf32>
    %7 = vector.broadcast %0 : vector<1x512xf32> to vector<16x512xf32>
    %8 = arith.addf %6, %7 : vector<16x512xf32>
    %cst_7 = arith.constant 2.000000e-01 : f32
    %9 = vector.broadcast %cst_7 : f32 to vector<16x512xf32>
    %10 = arith.mulf %9, %8 : vector<16x512xf32>
    %11 = arith.maximumf %8, %10 : vector<16x512xf32>
    %12 = arith.truncf %11 : vector<16x512xf32> to vector<16x512xbf16>
    %c0_8 = arith.constant 0 : index
    %c0_9 = arith.constant 0 : index
    %13 = vector.load %arg3[%c0_8, %c0_9] : memref<512x256xbf16, #tpu.memory_space<vmem>>, vector<512x256xbf16>
    %cst_10 = arith.constant dense<0.000000e+00> : vector<16x256xf32>
    %14 = tpu.matmul %12, %13, %cst_10 {dimension_numbers = #tpu.dot_dimension_numbers<[1], [0], [0], [1], [0, 0, 1, 1], [], []>} : vector<16x512xbf16>, vector<512x256xbf16>, vector<16x256xf32> -> vector<16x256xf32>
    %15 = vector.broadcast %1 : vector<1x256xf32> to vector<16x256xf32>
    %16 = arith.addf %14, %15 : vector<16x256xf32>
    %cst_11 = arith.constant 2.000000e-01 : f32
    %17 = vector.broadcast %cst_11 : f32 to vector<16x256xf32>
    %18 = arith.mulf %17, %16 : vector<16x256xf32>
    %19 = arith.maximumf %16, %18 : vector<16x256xf32>
    %c0_12 = arith.constant 0 : index
    %c0_13 = arith.constant 0 : index
    %20 = vector.load %arg4[%c0_12, %c0_13] : memref<1x256xf32, #tpu.memory_space<vmem>>, vector<1x256xf32>
    %21 = vector.broadcast %20 : vector<1x256xf32> to vector<16x256xf32>
    %22 = arith.mulf %19, %21 : vector<16x256xf32>
    %cst_14 = arith.constant dense<0.000000e+00> : vector<16xf32>
    %23 = vector.multi_reduction <add>, %22, %cst_14 [1] : vector<16x256xf32> to vector<16xf32>
    %24 = vector.shape_cast %23 : vector<16xf32> to vector<16x1xf32>
    %25 = vector.broadcast %2 : vector<1x1xf32> to vector<16x1xf32>
    %26 = arith.addf %24, %25 : vector<16x1xf32>
    %27 = arith.negf %26 : vector<16x1xf32>
    %28 = math.exp %27 : vector<16x1xf32>
    %cst_15 = arith.constant 1.000000e+00 : f32
    %29 = vector.broadcast %cst_15 : f32 to vector<16x1xf32>
    %30 = arith.addf %29, %28 : vector<16x1xf32>
    %31 = arith.divf %29, %30 : vector<16x1xf32>
    %c0_16 = arith.constant 0 : index
    %c0_17 = arith.constant 0 : index
    %32 = vector.load %arg6[%c0_16, %c0_17] : memref<16x1xf32, #tpu.memory_space<vmem>>, vector<16x1xf32>
    tpu.vector_store %arg6[%c0_16, %c0_17], %31 {strides = array<i32>} : memref<16x1xf32, #tpu.memory_space<vmem>>, vector<16x1xf32>,
    return
  }
  func.func @transform_0(%arg0: i32) -> (i32, i32) {
    %c0_i32 = arith.constant 0 : i32
    %c0_i32_0 = arith.constant 0 : i32
    return %arg0, %c0_i32 : i32, i32
  }
  func.func @transform_1(%arg0: i32) -> (i32, i32) {
    %c0_i32 = arith.constant 0 : i32
    %c0_i32_0 = arith.constant 0 : i32
    %c0_i32_1 = arith.constant 0 : i32
    return %c0_i32, %c0_i32_0 : i32, i32
  }
  func.func @transform_2(%arg0: i32) -> (i32, i32) {
    %c0_i32 = arith.constant 0 : i32
    %c0_i32_0 = arith.constant 0 : i32
    %c0_i32_1 = arith.constant 0 : i32
    return %c0_i32, %c0_i32_0 : i32, i32
  }
  func.func @transform_3(%arg0: i32) -> (i32, i32) {
    %c0_i32 = arith.constant 0 : i32
    %c0_i32_0 = arith.constant 0 : i32
    %c0_i32_1 = arith.constant 0 : i32
    return %c0_i32, %c0_i32_0 : i32, i32
  }
  func.func @transform_4(%arg0: i32) -> (i32, i32) {
    %c0_i32 = arith.constant 0 : i32
    %c0_i32_0 = arith.constant 0 : i32
    %c0_i32_1 = arith.constant 0 : i32
    return %c0_i32, %c0_i32_0 : i32, i32
  }
  func.func @transform_5(%arg0: i32) -> (i32, i32) {
    %c0_i32 = arith.constant 0 : i32
    %c0_i32_0 = arith.constant 0 : i32
    return %arg0, %c0_i32 : i32, i32
  }
}

</mosaic_0001>

<bundles_post_ra>
// kernel: tpu_custom_call.1
= control target key start
LH: loop header
LB: loop body
LE: loop exit
PB: predicated region body
PF: predicated region fallthrough
CT: control target
= control target key end

     0   :  { %10 = vsyncpa [#allocation3], 0  ;;  %s3122_s0 = inlined_call_operand.hbm [shape: f32[16,784], index: 0, kind: input, shape index: {}]   ;;  %s3123_s1 = inlined_call_operand.hbm [shape: bf16[784,512], index: 1, kind: input, shape index: {}]   ;;  %s3124_s2 = inlined_call_operand.hbm [shape: bf16[512,256], index: 2, kind: input, shape index: {}]   ;;  %s3125_s3 = inlined_call_operand.vmem [shape: f32[1,256], index: 3, kind: input, shape index: {}]   ;;  %s3126_s4 = inlined_call_operand.vmem [shape: f32[1,769], index: 4, kind: input, shape index: {}]   ;;  %s3127_s5 = inlined_call_operand.vmem [shape: f32[16,1], index: 5, kind: output, shape index: {}]  }
   0x1   :  { %11 = vsyncpa [#allocation5], 0  ;;  %s2974_s18 = smov [#allocation4]   ;;  %s2904_s22 = scalar_lea.hbm %s3123_s1, 25088 }
   0x2   :  { %s29_s19 = sshll.u32 %s2974_s18, 4  ;;  %p2905_p0 = scmp.ne.s32.totalorder %s3123_s1, %s2904_s22  ;;  %s30_s19 = int_to_ptr.vmem [resolvable:$true] %s29_s19 }
   0x3   :  { %p2908_p1 = scmp.lt.u32.totalorder %s2904_s22, %s3123_s1 }
   0x5   :  { %p2910_p2 = pnand %p2908_p1, %p2905_p0 }
   0x7   :  { %2913 = shalt.err (!%p2910_p2)
}
   0x8   :  { %s2914_s27 = scalar_lea.vmem %s30_s19, 25088  ;;  %p2919_p4 = scmp.lt.s32.totalorder %s30_s19, %s30_s19 }
   0x9   :  { %p2915_p3 = scmp.ne.s32.totalorder %s30_s19, %s2914_s27  ;;  %p2920_p5 = scmp.lt.s32.totalorder %s2914_s27, %s2914_s27 }
   0xb   :  { %p2921_p6 = por %p2920_p5, %p2919_p4 }
   0xd   :  { %p2922_p7 = pnand %p2921_p6, %p2915_p3 }
   0xf   :  { %2925 = shalt.err (!%p2922_p7)
}
  0x10   :  { %s2975_s28 = smov 256   ;;  %s2976_s29 = smov 16  }
  0x11   :  { %35 = dma.hbm_to_vmem [thread:$0]  %s3123_s1, 25088, %s30_s19, [#allocation5], %s2975_s28, %s2975_s28, %s2976_s29  }
  0x12   :  { %s2977_s7 = smov [#allocation2]   ;;  %s2926_s11 = scalar_lea.hbm %s3122_s0, 1792 }
  0x13   :  { %s17_s8 = sshll.u32 %s2977_s7, 4  ;;  %p2927_p8 = scmp.ne.s32.totalorder %s3122_s0, %s2926_s11  ;;  %s18_s8 = int_to_ptr.vmem [resolvable:$true] %s17_s8 }
  0x14   :  { %p2930_p9 = scmp.lt.u32.totalorder %s2926_s11, %s3122_s0 }
  0x16   :  { %p2932_p10 = pnand %p2930_p9, %p2927_p8 }
  0x18   :  { %2935 = shalt.err (!%p2932_p10)
}
  0x19   :  { %s2936_s16 = scalar_lea.vmem %s18_s8, 1792  ;;  %p2941_p12 = scmp.lt.s32.totalorder %s18_s8, %s18_s8 }
  0x1a   :  { %p2937_p11 = scmp.ne.s32.totalorder %s18_s8, %s2936_s16  ;;  %p2942_p13 = scmp.lt.s32.totalorder %s2936_s16, %s2936_s16 }
  0x1c   :  { %p2943_p0 = por %p2942_p13, %p2941_p12 }
  0x1e   :  { %p2944_p1 = pnand %p2943_p0, %p2937_p11 }
  0x20   :  { %2947 = shalt.err (!%p2944_p1)
}
  0x21   :  { %s2978_s1 = smov 896   ;;  %s2979_s17 = smov 56  }
  0x22   :  { %23 = dma.hbm_to_vmem [thread:$0]  %s3122_s0, 1792, %s18_s8, [#allocation3], %s2978_s1, %s2978_s1, %s2979_s17  }
  0x23   :  { %s2980_s20 = smov [#allocation6]   ;;  %s2948_s24 = scalar_lea.hbm %s3124_s2, 8192 }
  0x24   :  { %s41_s21 = sshll.u32 %s2980_s20, 4  ;;  %p2949_p2 = scmp.ne.s32.totalorder %s3124_s2, %s2948_s24  ;;  %s42_s21 = int_to_ptr.vmem [resolvable:$true] %s41_s21 }
  0x25   :  { %p2952_p3 = scmp.lt.u32.totalorder %s2948_s24, %s3124_s2 }
  0x27   :  { %p2954_p4 = pnand %p2952_p3, %p2949_p2 }
  0x29   :  { %2957 = shalt.err (!%p2954_p4)
}
  0x2a   :  { %s2958_s29 = scalar_lea.vmem %s42_s21, 8192  ;;  %p2963_p6 = scmp.lt.s32.totalorder %s42_s21, %s42_s21 }
  0x2b   :  { %p2959_p5 = scmp.ne.s32.totalorder %s42_s21, %s2958_s29  ;;  %p2964_p7 = scmp.lt.s32.totalorder %s2958_s29, %s2958_s29 }
  0x2d   :  { %p2965_p8 = por %p2964_p7, %p2963_p6 }
  0x2f   :  { %p2966_p9 = pnand %p2965_p8, %p2959_p5 }
  0x31   :  { %2969 = shalt.err (!%p2966_p9)
}
  0x32   :  { %s2981_s0 = smov 128   ;;  %s2982_s30 = smov 8  }
  0x33   :  { %47 = dma.hbm_to_vmem [thread:$0]  %s3124_s2, 8192, %s42_s21, [#allocation5], %s2981_s0, %s2981_s0, %s2982_s30  }
  0x34   :  { %2970 = dma.done.wait [#allocation3], 1792  }
  0x35   :  { %2971 = vsyncadd [#allocation3], 4294965504 }
  0x36   :  { %2972 = dma.done.wait [#allocation5], 33280  }
  0x37   :  { %2973 = vsyncadd [#allocation5], 4294934016  ;;  %v2506_v0 = vld [vmem:[#allocation4 + $0x4] ss:$16 sps:$4 sm:$0xff]   ;;  %v2510_v2 = vld [vmem:[#allocation4] ss:$16 sps:$4 sm:$0xff]  }
  0x38   :  { %v2508_v1 = vld [vmem:[#allocation4 + $0x204] ss:$16 sps:$4 sm:$0xff]   ;;  %1287 = vmatprep.subr.bf16.mxu1 %v2506_v0  ;;  %v2511_v3 = vld [vmem:[#allocation4 + $0x200] ss:$16 sps:$4 sm:$0xff]   ;;  %v66_v46 = vld [vmem:[#allocation2 + $0x8] sm:$0xff]  ;;  %vm1283_vm0 = vcmask 130048  }
  0x39   :  { %1330 = vmatprep.subr.bf16.mxu0 %v2508_v1  ;;  %v2512_v4 = vld [vmem:[#allocation4 + $0x24] ss:$16 sps:$4 sm:$0xff]   ;;  %1288 = vmatpush1.bf16.msra.mxu1 %v2510_v2  ;;  %v2516_v6 = vld [vmem:[#allocation4 + $0x20] ss:$16 sps:$4 sm:$0xff]   ;;  %v68_v51 = vld [vmem:[#allocation2 + $0x18] sm:$0xff]  ;;  %vm2182_vm1 = vcmask 7168  }
  0x3a   :  { %1331 = vmatpush1.bf16.msra.mxu0 %v2511_v3  ;;  %v2514_v5 = vld [vmem:[#allocation4 + $0x224] ss:$16 sps:$4 sm:$0xff]   ;;  %1289 = vmatprep.subr.bf16.mxu1 %v2512_v4  ;;  %v2517_v7 = vld [vmem:[#allocation4 + $0x220] ss:$16 sps:$4 sm:$0xff]  }
  0x3b   :  { %1332 = vmatprep.subr.bf16.mxu0 %v2514_v5  ;;  %v2518_v8 = vld [vmem:[#allocation4 + $0x44] ss:$16 sps:$4 sm:$0xff]   ;;  %v2522_v10 = vld [vmem:[#allocation4 + $0x40] ss:$16 sps:$4 sm:$0xff]  }
  0x3c   :  { %v2520_v9 = vld [vmem:[#allocation4 + $0x244] ss:$16 sps:$4 sm:$0xff]   ;;  %v2523_v11 = vld [vmem:[#allocation4 + $0x240] ss:$16 sps:$4 sm:$0xff]  }
  0x3d   :  { %1290 = vmatpush1.bf16.msra.mxu1 %v2516_v6  ;;  %v2524_v12 = vld [vmem:[#allocation4 + $0x64] ss:$16 sps:$4 sm:$0xff]   ;;  %v2528_v14 = vld [vmem:[#allocation4 + $0x60] ss:$16 sps:$4 sm:$0xff]  }
  0x3e   :  { %1333 = vmatpush1.bf16.msra.mxu0 %v2517_v7  ;;  %1291 = vmatprep.subr.bf16.mxu1 %v2518_v8  ;;  %v2526_v13 = vld [vmem:[#allocation4 + $0x264] ss:$16 sps:$4 sm:$0xff]   ;;  %v2529_v15 = vld [vmem:[#allocation4 + $0x260] ss:$16 sps:$4 sm:$0xff]   ;;  %v72_v7 = vld [vmem:[#allocation2 + $0x38] sm:$0xff] }
  0x3f   :  { %1334 = vmatprep.subr.bf16.mxu0 %v2520_v9  ;;  %v2530_v16 = vld [vmem:[#allocation4 + $0x84] ss:$16 sps:$4 sm:$0xff]   ;;  %v2534_v18 = vld [vmem:[#allocation4 + $0x80] ss:$16 sps:$4 sm:$0xff]  }
  0x40   :  { %v2532_v17 = vld [vmem:[#allocation4 + $0x284] ss:$16 sps:$4 sm:$0xff]   ;;  %v2535_v19 = vld [vmem:[#allocation4 + $0x280] ss:$16 sps:$4 sm:$0xff]  }
  0x41   :  { %1292 = vmatpush1.bf16.msra.mxu1 %v2522_v10  ;;  %v2536_v20 = vld [vmem:[#allocation4 + $0xa4] ss:$16 sps:$4 sm:$0xff]   ;;  %v2540_v22 = vld [vmem:[#allocation4 + $0xa0] ss:$16 sps:$4 sm:$0xff]   ;;  %v74_v10 = vld [vmem:[#allocation2 + $0x48] sm:$0xff] }
  0x42   :  { %1335 = vmatpush1.bf16.msra.mxu0 %v2523_v11  ;;  %1293 = vmatprep.subr.bf16.mxu1 %v2524_v12  ;;  %v2538_v21 = vld [vmem:[#allocation4 + $0x2a4] ss:$16 sps:$4 sm:$0xff]   ;;  %v2541_v23 = vld [vmem:[#allocation4 + $0x2a0] ss:$16 sps:$4 sm:$0xff]   ;;  %v2607_v11 = vld [vmem:[#allocation4 + $0xc] ss:$16 sps:$4 sm:$0xff]  }
  0x43   :  { %1336 = vmatprep.subr.bf16.mxu0 %v2526_v13  ;;  %v2542_v24 = vld [vmem:[#allocation4 + $0xc4] ss:$16 sps:$4 sm:$0xff]   ;;  %v2546_v26 = vld [vmem:[#allocation4 + $0xc0] ss:$16 sps:$4 sm:$0xff]  }
  0x44   :  { %v2544_v25 = vld [vmem:[#allocation4 + $0x2c4] ss:$16 sps:$4 sm:$0xff]   ;;  %v2547_v27 = vld [vmem:[#allocation4 + $0x2c0] ss:$16 sps:$4 sm:$0xff]  }
  0x45   :  { %1294 = vmatpush1.bf16.msra.mxu1 %v2528_v14  ;;  %v2548_v28 = vld [vmem:[#allocation4 + $0xe4] ss:$16 sps:$4 sm:$0xff]   ;;  %v2552_v30 = vld [vmem:[#allocation4 + $0xe0] ss:$16 sps:$4 sm:$0xff]   ;;  %v2605_v14 = vld [vmem:[#allocation4 + $0x8] ss:$16 sps:$4 sm:$0xff]  }
  0x46   :  { %1337 = vmatpush1.bf16.msra.mxu0 %v2529_v15  ;;  %1295 = vmatprep.subr.bf16.mxu1 %v2530_v16  ;;  %v2550_v29 = vld [vmem:[#allocation4 + $0x2e4] ss:$16 sps:$4 sm:$0xff]   ;;  %v2553_v31 = vld [vmem:[#allocation4 + $0x2e0] ss:$16 sps:$4 sm:$0xff]  }
  0x47   :  { %1338 = vmatprep.subr.bf16.mxu0 %v2532_v17  ;;  %v2554_v32 = vld [vmem:[#allocation4 + $0x104] ss:$16 sps:$4 sm:$0xff]   ;;  %v2558_v34 = vld [vmem:[#allocation4 + $0x100] ss:$16 sps:$4 sm:$0xff]   ;;  %v2613_v17 = vld [vmem:[#allocation4 + $0x2c] ss:$16 sps:$4 sm:$0xff]  }
  0x48   :  { %v2556_v33 = vld [vmem:[#allocation4 + $0x304] ss:$16 sps:$4 sm:$0xff]   ;;  %v2559_v35 = vld [vmem:[#allocation4 + $0x300] ss:$16 sps:$4 sm:$0xff]  }
  0x49   :  { %1296 = vmatpush1.bf16.msra.mxu1 %v2534_v18  ;;  %v2560_v36 = vld [vmem:[#allocation4 + $0x124] ss:$16 sps:$4 sm:$0xff]   ;;  %v2564_v38 = vld [vmem:[#allocation4 + $0x120] ss:$16 sps:$4 sm:$0xff]  }
  0x4a   :  { %1339 = vmatpush1.bf16.msra.mxu0 %v2535_v19  ;;  %1297 = vmatprep.subr.bf16.mxu1 %v2536_v20  ;;  %v2562_v37 = vld [vmem:[#allocation4 + $0x324] ss:$16 sps:$4 sm:$0xff]   ;;  %v2565_v39 = vld [vmem:[#allocation4 + $0x320] ss:$16 sps:$4 sm:$0xff]   ;;  %v2611_v19 = vld [vmem:[#allocation4 + $0x28] ss:$16 sps:$4 sm:$0xff]  }
  0x4b   :  { %1340 = vmatprep.subr.bf16.mxu0 %v2538_v21  ;;  %v2566_v40 = vld [vmem:[#allocation4 + $0x144] ss:$16 sps:$4 sm:$0xff]   ;;  %v2570_v42 = vld [vmem:[#allocation4 + $0x140] ss:$16 sps:$4 sm:$0xff]   ;;  %v2619_v21 = vld [vmem:[#allocation4 + $0x4c] ss:$16 sps:$4 sm:$0xff]  }
  0x4c   :  { %v2568_v41 = vld [vmem:[#allocation4 + $0x344] ss:$16 sps:$4 sm:$0xff]   ;;  %v2571_v43 = vld [vmem:[#allocation4 + $0x340] ss:$16 sps:$4 sm:$0xff]  }
  0x4d   :  { %1298 = vmatpush1.bf16.msra.mxu1 %v2540_v22  ;;  %v2572_v44 = vld [vmem:[#allocation4 + $0x164] ss:$16 sps:$4 sm:$0xff]   ;;  %v2576_v47 = vld [vmem:[#allocation4 + $0x160] ss:$16 sps:$4 sm:$0xff]  }
  0x4e   :  { %1341 = vmatpush1.bf16.msra.mxu0 %v2541_v23  ;;  %1299 = vmatprep.subr.bf16.mxu1 %v2542_v24  ;;  %v2574_v45 = vld [vmem:[#allocation4 + $0x364] ss:$16 sps:$4 sm:$0xff]   ;;  %v2577_v48 = vld [vmem:[#allocation4 + $0x360] ss:$16 sps:$4 sm:$0xff]   ;;  %v2617_v23 = vld [vmem:[#allocation4 + $0x48] ss:$16 sps:$4 sm:$0xff]  }
  0x4f   :  { %1342 = vmatprep.subr.bf16.mxu0 %v2544_v25  ;;  %v73_v49 = vld [vmem:[#allocation2 + $0x40] sm:$0xff]  ;;  %v75_v52 = vld [vmem:[#allocation2 + $0x50] sm:$0xff]  ;;  %v2625_v25 = vld [vmem:[#allocation4 + $0x6c] ss:$16 sps:$4 sm:$0xff]  }
  0x50   :  { %v3050_v50 = vpack.c.bf16 %v73_v49, %v66_v46  ;;  %v2578_v53 = vld [vmem:[#allocation4 + $0x184] ss:$16 sps:$4 sm:$0xff]   ;;  %v3052_v55 = vpack.c.bf16 %v75_v52, %v68_v51  ;;  %v2582_v56 = vld [vmem:[#allocation4 + $0x180] ss:$16 sps:$4 sm:$0xff]   ;;  %v2647_v46 = vld [vmem:[#allocation4 + $0xe8] ss:$16 sps:$4 sm:$0xff]  }
  0x51   :  { %1300 = vmatpush1.bf16.msra.mxu1 %v2546_v26  ;;  %v2580_v54 = vld [vmem:[#allocation4 + $0x384] ss:$16 sps:$4 sm:$0xff]   ;;  %v2583_v57 = vld [vmem:[#allocation4 + $0x380] ss:$16 sps:$4 sm:$0xff]   ;;  %v2661_v52 = vld [vmem:[#allocation4 + $0x12c] ss:$16 sps:$4 sm:$0xff]  }
  0x52   :  { %1343 = vmatpush1.bf16.msra.mxu0 %v2547_v27  ;;  %1301 = vmatprep.subr.bf16.mxu1 %v2548_v28  ;;  %v2584_v58 = vld [vmem:[#allocation4 + $0x1a4] ss:$16 sps:$4 sm:$0xff]   ;;  %v2588_v60 = vld [vmem:[#allocation4 + $0x1a0] ss:$16 sps:$4 sm:$0xff]   ;;  %v2623_v27 = vld [vmem:[#allocation4 + $0x68] ss:$16 sps:$4 sm:$0xff]  }
  0x53   :  { %1344 = vmatprep.subr.bf16.mxu0 %v2550_v29  ;;  %1319 = vmatprep.mubr.bf16.mxu1 %v3050_v50  ;;  %v2586_v59 = vld [vmem:[#allocation4 + $0x3a4] ss:$16 sps:$4 sm:$0xff]   ;;  %v2589_v61 = vld [vmem:[#allocation4 + $0x3a0] ss:$16 sps:$4 sm:$0xff]   ;;  %v2631_v29 = vld [vmem:[#allocation4 + $0x8c] ss:$16 sps:$4 sm:$0xff]  }
  0x54   :  { %1362 = vmatprep.mubr.bf16.mxu0 %v3052_v55  ;;  %v2590_v62 = vld [vmem:[#allocation4 + $0x1c4] ss:$16 sps:$4 sm:$0xff]   ;;  %v2594_v0 = vld [vmem:[#allocation4 + $0x1c0] ss:$16 sps:$4 sm:$0xff]  }
  0x55   :  { %1302 = vmatpush1.bf16.msra.mxu1 %v2552_v30  ;;  %v2592_v63 = vld [vmem:[#allocation4 + $0x3c4] ss:$16 sps:$4 sm:$0xff]   ;;  %v2595_v1 = vld [vmem:[#allocation4 + $0x3c0] ss:$16 sps:$4 sm:$0xff]  }
  0x56   :  { %1345 = vmatpush1.bf16.msra.mxu0 %v2553_v31  ;;  %1303 = vmatprep.subr.bf16.mxu1 %v2554_v32  ;;  %v2596_v2 = vld [vmem:[#allocation4 + $0x1e4] ss:$16 sps:$4 sm:$0xff]   ;;  %v2600_v4 = vld [vmem:[#allocation4 + $0x1e0] ss:$16 sps:$4 sm:$0xff]   ;;  %v2629_v31 = vld [vmem:[#allocation4 + $0x88] ss:$16 sps:$4 sm:$0xff]  }
  0x57   :  { %1346 = vmatprep.subr.bf16.mxu0 %v2556_v33  ;;  %v2598_v3 = vld [vmem:[#allocation4 + $0x3e4] ss:$16 sps:$4 sm:$0xff]   ;;  %v2601_v5 = vld [vmem:[#allocation4 + $0x3e0] ss:$16 sps:$4 sm:$0xff]   ;;  %v2637_v33 = vld [vmem:[#allocation4 + $0xac] ss:$16 sps:$4 sm:$0xff]  }
  0x58   :  { %v65_v6 = vld [vmem:[#allocation2] sm:$0xff]  ;;  %v67_v9 = vld [vmem:[#allocation2 + $0x10] sm:$0xff] }
  0x59   :  { %1304 = vmatpush1.bf16.msra.mxu1 %v2558_v34  ;;  %v2604_v8 = vld [vmem:[#allocation4 + $0x404] ss:$16 sps:$4 sm:$0xff]   ;;  %v3056_v12 = vpack.c.bf16 %v72_v7, %v65_v6  ;;  %v2602_v13 = vld [vmem:[#allocation4 + $0x400] ss:$16 sps:$4 sm:$0xff]   ;;  %v3058_v15 = vpack.c.bf16 %v74_v10, %v67_v9  ;;  %v2683_v7 = vld [vmem:[#allocation4 + $0x1a8] ss:$16 sps:$4 sm:$0xff]  }
  0x5a   :  { %1347 = vmatpush1.bf16.msra.mxu0 %v2559_v35  ;;  %1305 = vmatprep.subr.bf16.mxu1 %v2560_v36  ;;  %v2610_v16 = vld [vmem:[#allocation4 + $0x424] ss:$16 sps:$4 sm:$0xff]   ;;  %v2608_v18 = vld [vmem:[#allocation4 + $0x420] ss:$16 sps:$4 sm:$0xff]   ;;  %v2635_v35 = vld [vmem:[#allocation4 + $0xa8] ss:$16 sps:$4 sm:$0xff]  }
  0x5b   :  { %1348 = vmatprep.subr.bf16.mxu0 %v2562_v37  ;;  %v2616_v20 = vld [vmem:[#allocation4 + $0x444] ss:$16 sps:$4 sm:$0xff]   ;;  %v2614_v22 = vld [vmem:[#allocation4 + $0x440] ss:$16 sps:$4 sm:$0xff]   ;;  %v2643_v37 = vld [vmem:[#allocation4 + $0xcc] ss:$16 sps:$4 sm:$0xff]  }
  0x5c   :  { %v2622_v24 = vld [vmem:[#allocation4 + $0x464] ss:$16 sps:$4 sm:$0xff]   ;;  %v2620_v26 = vld [vmem:[#allocation4 + $0x460] ss:$16 sps:$4 sm:$0xff]   ;;  %v2691_v9 = vld [vmem:[#allocation4 + $0x1cc] ss:$16 sps:$4 sm:$0xff]  }
  0x5d   :  { %1306 = vmatpush1.bf16.msra.mxu1 %v2564_v38  ;;  %v2628_v28 = vld [vmem:[#allocation4 + $0x484] ss:$16 sps:$4 sm:$0xff]   ;;  %v2626_v30 = vld [vmem:[#allocation4 + $0x480] ss:$16 sps:$4 sm:$0xff]  }
  0x5e   :  { %1349 = vmatpush1.bf16.msra.mxu0 %v2565_v39  ;;  %1307 = vmatprep.subr.bf16.mxu1 %v2566_v40  ;;  %v2634_v32 = vld [vmem:[#allocation4 + $0x4a4] ss:$16 sps:$4 sm:$0xff]   ;;  %v2632_v34 = vld [vmem:[#allocation4 + $0x4a0] ss:$16 sps:$4 sm:$0xff]   ;;  %v2641_v39 = vld [vmem:[#allocation4 + $0xc8] ss:$16 sps:$4 sm:$0xff]  }
  0x5f   :  { %1350 = vmatprep.subr.bf16.mxu0 %v2568_v41  ;;  %v2640_v36 = vld [vmem:[#allocation4 + $0x4c4] ss:$16 sps:$4 sm:$0xff]   ;;  %v2638_v38 = vld [vmem:[#allocation4 + $0x4c0] ss:$16 sps:$4 sm:$0xff]   ;;  %v70_v41 = vld [vmem:[#allocation2 + $0x28] sm:$0xff] }
  0x60   :  { %v2646_v40 = vld [vmem:[#allocation4 + $0x4e4] ss:$16 sps:$4 sm:$0xff]   ;;  %v2650_v49 = vld [vmem:[#allocation4 + $0x500] ss:$16 sps:$4 sm:$0xff]  }
  0x61   :  { %1308 = vmatpush1.bf16.msra.mxu1 %v2570_v42  ;;  %v77_v42 = vld [vmem:[#allocation2 + $0x60] sm:$0xff] }
  0x62   :  { %1351 = vmatpush1.bf16.msra.mxu0 %v2571_v43  ;;  %1309 = vmatprep.subr.bf16.mxu1 %v2572_v44  ;;  %v2649_v43 = vld [vmem:[#allocation4 + $0xec] ss:$16 sps:$4 sm:$0xff]   ;;  %v3063_v44 = vpack.c.bf16 %v77_v42, %v70_v41  ;;  %v2658_v51 = vld [vmem:[#allocation4 + $0x524] ss:$16 sps:$4 sm:$0xff]   ;;  %v2680_v6 = vld [vmem:[#allocation4 + $0x5a0] ss:$16 sps:$4 sm:$0xff]  }
  0x63   :  { %1352 = vmatprep.subr.bf16.mxu0 %v2574_v45  ;;  %v2644_v45 = vld [vmem:[#allocation4 + $0x4e0] ss:$16 sps:$4 sm:$0xff]   ;;  %v2802_v41 = vld [vmem:[#allocation6 + $0x4] ss:$8 sps:$4 sm:$0xff]   ;;  %v2805_v42 = vld [vmem:[#allocation6 + $0x14] ss:$8 sps:$4 sm:$0xff]  }
  0x64   :  { %v2686_v10 = vld [vmem:[#allocation4 + $0x5c0] ss:$16 sps:$4 sm:$0xff]  }
  0x65   :  { %1310 = vmatpush1.bf16.msra.mxu1 %v2576_v47  ;;  %v2652_v47 = vld [vmem:[#allocation4 + $0x504] ss:$16 sps:$4 sm:$0xff]  }
  0x66   :  { %1353 = vmatpush1.bf16.msra.mxu0 %v2577_v48  ;;  %1311 = vmatprep.subr.bf16.mxu1 %v2578_v53  ;;  %v2655_v48 = vld [vmem:[#allocation4 + $0x10c] ss:$16 sps:$4 sm:$0xff]   ;;  %v2656_v53 = vld [vmem:[#allocation4 + $0x520] ss:$16 sps:$4 sm:$0xff]  }
  0x67   :  { %1354 = vmatprep.subr.bf16.mxu0 %v2580_v54  ;;  %v2659_v54 = vld [vmem:[#allocation4 + $0x128] ss:$16 sps:$4 sm:$0xff]  }
  0x69   :  { %1312 = vmatpush1.bf16.msra.mxu1 %v2582_v56  ;;  %v2664_v56 = vld [vmem:[#allocation4 + $0x544] ss:$16 sps:$4 sm:$0xff]  }
  0x6a   :  { %1355 = vmatpush1.bf16.msra.mxu0 %v2583_v57  ;;  %1313 = vmatprep.subr.bf16.mxu1 %v2584_v58  ;;  %v2667_v57 = vld [vmem:[#allocation4 + $0x14c] ss:$16 sps:$4 sm:$0xff]   ;;  %v2662_v58 = vld [vmem:[#allocation4 + $0x540] ss:$16 sps:$4 sm:$0xff]  }
  0x6b   :  { %1356 = vmatprep.subr.bf16.mxu0 %v2586_v59  ;;  %v2665_v59 = vld [vmem:[#allocation4 + $0x148] ss:$16 sps:$4 sm:$0xff]  }
  0x6d   :  { %1314 = vmatpush1.bf16.msra.mxu1 %v2588_v60  ;;  %v2670_v60 = vld [vmem:[#allocation4 + $0x564] ss:$16 sps:$4 sm:$0xff]  }
  0x6e   :  { %1357 = vmatpush1.bf16.msra.mxu0 %v2589_v61  ;;  %1315 = vmatprep.subr.bf16.mxu1 %v2590_v62  ;;  %v2673_v61 = vld [vmem:[#allocation4 + $0x16c] ss:$16 sps:$4 sm:$0xff]   ;;  %v2668_v62 = vld [vmem:[#allocation4 + $0x560] ss:$16 sps:$4 sm:$0xff]  }
  0x6f   :  { %1358 = vmatprep.subr.bf16.mxu0 %v2592_v63  ;;  %v2671_v63 = vld [vmem:[#allocation4 + $0x168] ss:$16 sps:$4 sm:$0xff]  }
  0x71   :  { %1316 = vmatpush1.bf16.msra.mxu1 %v2594_v0  ;;  %v2676_v0 = vld [vmem:[#allocation4 + $0x584] ss:$16 sps:$4 sm:$0xff]  }
  0x72   :  { %1359 = vmatpush1.bf16.msra.mxu0 %v2595_v1  ;;  %1317 = vmatprep.subr.bf16.mxu1 %v2596_v2  ;;  %v2679_v1 = vld [vmem:[#allocation4 + $0x18c] ss:$16 sps:$4 sm:$0xff]   ;;  %v2674_v2 = vld [vmem:[#allocation4 + $0x580] ss:$16 sps:$4 sm:$0xff]  }
  0x73   :  { %1360 = vmatprep.subr.bf16.mxu0 %v2598_v3  ;;  %v2677_v3 = vld [vmem:[#allocation4 + $0x188] ss:$16 sps:$4 sm:$0xff]  }
  0x75   :  { %1318 = vmatpush1.bf16.msra.mxu1 %v2600_v4  ;;  %v2682_v4 = vld [vmem:[#allocation4 + $0x5a4] ss:$16 sps:$4 sm:$0xff]  }
  0x76   :  { %1361 = vmatpush1.bf16.msra.mxu0 %v2601_v5  ;;  %1459 = vmatprep.subr.bf16.mxu1 %v2607_v11  ;;  %v2685_v5 = vld [vmem:[#allocation4 + $0x1ac] ss:$16 sps:$4 sm:$0xff]   ;;  %v2689_v11 = vld [vmem:[#allocation4 + $0x1c8] ss:$16 sps:$4 sm:$0xff]  }
  0x77   :  { %1373 = vmatprep.subr.bf16.mxu0 %v2604_v8  ;;  %v2688_v8 = vld [vmem:[#allocation4 + $0x5c4] ss:$16 sps:$4 sm:$0xff]  }
  0x78   :  { %1320 = vmatmul.mubr.bf16.vlgmr.msra.gmra.mrb[0].mxu1 %v3056_v12 }
  0x79   :  { %1363 = vmatmul.mubr.bf16.vlgmr.msra.gmra.mrb[0].mxu0 %v3058_v15  ;;  %1460 = vmatpush1.bf16.msra.mxu1 %v2605_v14  ;;  %v2697_v14 = vld [vmem:[#allocation4 + $0x1ec] ss:$16 sps:$4 sm:$0xff]  }
  0x7a   :  { %1374 = vmatpush1.bf16.msra.mxu0 %v2602_v13  ;;  %1461 = vmatprep.subr.bf16.mxu1 %v2613_v17  ;;  %v2694_v13 = vld [vmem:[#allocation4 + $0x5e4] ss:$16 sps:$4 sm:$0xff]   ;;  %v2695_v17 = vld [vmem:[#allocation4 + $0x1e8] ss:$16 sps:$4 sm:$0xff]  }
  0x7b   :  { %1375 = vmatprep.subr.bf16.mxu0 %v2610_v16  ;;  %1491 = vmatprep.mubr.bf16.mxu1 %v3050_v50  ;;  %v2653_v50 = vld [vmem:[#allocation4 + $0x108] ss:$16 sps:$4 sm:$0xff]   ;;  %v2692_v16 = vld [vmem:[#allocation4 + $0x5e0] ss:$16 sps:$4 sm:$0xff]  }
  0x7c   :  { %1405 = vmatprep.mubr.bf16.mxu0 %v3063_v44 }
  0x7d   :  { %1462 = vmatpush1.bf16.msra.mxu1 %v2611_v19  ;;  %v76_v19 = vld [vmem:[#allocation2 + $0x58] sm:$0xff] }
  0x7e   :  { %1376 = vmatpush1.bf16.msra.mxu0 %v2608_v18  ;;  %1463 = vmatprep.subr.bf16.mxu1 %v2619_v21  ;;  %v69_v18 = vld [vmem:[#allocation2 + $0x20] sm:$0xff] }
  0x7f   :  { %1377 = vmatprep.subr.bf16.mxu0 %v2616_v20  ;;  %v2700_v20 = vld [vmem:[#allocation4 + $0x20c] ss:$16 sps:$4 sm:$0xff]   ;;  %v2706_v21 = vld [vmem:[#allocation4 + $0x604] ss:$16 sps:$4 sm:$0xff]  }
  0x81   :  { %1464 = vmatpush1.bf16.msra.mxu1 %v2617_v23  ;;  %v2698_v23 = vld [vmem:[#allocation4 + $0x208] ss:$16 sps:$4 sm:$0xff]  }
  0x82   :  { %1378 = vmatpush1.bf16.msra.mxu0 %v2614_v22  ;;  %1465 = vmatprep.subr.bf16.mxu1 %v2625_v25  ;;  %v3066_v22 = vpack.c.bf16 %v76_v19, %v69_v18  ;;  %v2703_v25 = vld [vmem:[#allocation4 + $0x22c] ss:$16 sps:$4 sm:$0xff]   ;;  %v2749_v19 = vld [vmem:[#allocation4 + $0x408] ss:$16 sps:$4 sm:$0xff]  }
  0x83   :  { %1379 = vmatprep.subr.bf16.mxu0 %v2622_v24  ;;  %v2704_v24 = vld [vmem:[#allocation4 + $0x600] ss:$16 sps:$4 sm:$0xff]   ;;  %v2832_v18 = vld [vmem:[#allocation6 + $0xa4] ss:$8 sps:$4 sm:$0xff]  }
  0x85   :  { %1466 = vmatpush1.bf16.msra.mxu1 %v2623_v27  ;;  %v2709_v27 = vld [vmem:[#allocation4 + $0x24c] ss:$16 sps:$4 sm:$0xff]  }
  0x86   :  { %1380 = vmatpush1.bf16.msra.mxu0 %v2620_v26  ;;  %1467 = vmatprep.subr.bf16.mxu1 %v2631_v29  ;;  %v2701_v26 = vld [vmem:[#allocation4 + $0x228] ss:$16 sps:$4 sm:$0xff]  }
  0x87   :  { %1381 = vmatprep.subr.bf16.mxu0 %v2628_v28  ;;  %v2983_v28 = vmov 0   ;;  %v2707_v29 = vld [vmem:[#allocation4 + $0x248] ss:$16 sps:$4 sm:$0xff]  }
  0x89   :  { %1468 = vmatpush1.bf16.msra.mxu1 %v2629_v31  ;;  %v78_v31 = vld [vmem:[#allocation2 + $0x68] sm:$0xff] }
  0x8a   :  { %1382 = vmatpush1.bf16.msra.mxu0 %v2626_v30  ;;  %1469 = vmatprep.subr.bf16.mxu1 %v2637_v33  ;;  %v71_v30 = vld [vmem:[#allocation2 + $0x30] sm:$0xff]  ;;  %v2710_v33 = vld [vmem:[#allocation4 + $0x268] ss:$16 sps:$4 sm:$0xff]  }
  0x8b   :  { %1383 = vmatprep.subr.bf16.mxu0 %v2634_v32  ;;  %v2712_v32 = vld [vmem:[#allocation4 + $0x26c] ss:$16 sps:$4 sm:$0xff]  }
  0x8d   :  { %1470 = vmatpush1.bf16.msra.mxu1 %v2635_v35  ;;  %v2713_v35 = vld [vmem:[#allocation4 + $0x288] ss:$16 sps:$4 sm:$0xff]  }
  0x8e   :  { %1384 = vmatpush1.bf16.msra.mxu0 %v2632_v34  ;;  %1471 = vmatprep.subr.bf16.mxu1 %v2643_v37  ;;  %v3072_v34 = vpack.c.bf16 %v78_v31, %v71_v30  ;;  %v2716_v37 = vld [vmem:[#allocation4 + $0x2a8] ss:$16 sps:$4 sm:$0xff]   ;;  %v2760_v30 = vld [vmem:[#allocation4 + $0x46c] ss:$16 sps:$4 sm:$0xff]  }
  0x8f   :  { %1385 = vmatprep.subr.bf16.mxu0 %v2640_v36  ;;  %v2718_v36 = vld [vmem:[#allocation4 + $0x2ac] ss:$16 sps:$4 sm:$0xff]   ;;  %v2836_v31 = vld [vmem:[#allocation6 + $0xc0] ss:$8 sps:$4 sm:$0xff]  }
  0x91   :  { %1472 = vmatpush1.bf16.msra.mxu1 %v2641_v39  ;;  %v2724_v39 = vld [vmem:[#allocation4 + $0x2ec] ss:$16 sps:$4 sm:$0xff]  }
  0x92   :  { %1386 = vmatpush1.bf16.msra.mxu0 %v2638_v38  ;;  %1473 = vmatprep.subr.bf16.mxu1 %v2649_v43  ;;  %v2721_v38 = vld [vmem:[#allocation4 + $0x2cc] ss:$16 sps:$4 sm:$0xff]   ;;  %v2722_v43 = vld [vmem:[#allocation4 + $0x2e8] ss:$16 sps:$4 sm:$0xff]  }
  0x93   :  { %1387 = vmatprep.subr.bf16.mxu0 %v2646_v40  ;;  %v2800_v40 = vld [vmem:[#allocation6] ss:$8 sps:$4 sm:$0xff]  }
  0x95   :  { %1474 = vmatpush1.bf16.msra.mxu1 %v2647_v46  ;;  %v2803_v46 = vld [vmem:[#allocation6 + $0x10] ss:$8 sps:$4 sm:$0xff]  }
  0x96   :  { %1388 = vmatpush1.bf16.msra.mxu0 %v2644_v45  ;;  %1475 = vmatprep.subr.bf16.mxu1 %v2655_v48  ;;  %v2727_v45 = vld [vmem:[#allocation4 + $0x30c] ss:$16 sps:$4 sm:$0xff]   ;;  %v2725_v48 = vld [vmem:[#allocation4 + $0x308] ss:$16 sps:$4 sm:$0xff]  }
  0x97   :  { %1389 = vmatprep.subr.bf16.mxu0 %v2652_v47  ;;  %v2808_v47 = vld [vmem:[#allocation6 + $0x24] ss:$8 sps:$4 sm:$0xff]  }
  0x99   :  { %1476 = vmatpush1.bf16.msra.mxu1 %v2653_v50  ;;  %v2806_v50 = vld [vmem:[#allocation6 + $0x20] ss:$8 sps:$4 sm:$0xff]  }
  0x9a   :  { %1390 = vmatpush1.bf16.msra.mxu0 %v2650_v49  ;;  %1477 = vmatprep.subr.bf16.mxu1 %v2661_v52  ;;  %v2730_v49 = vld [vmem:[#allocation4 + $0x32c] ss:$16 sps:$4 sm:$0xff]  }
  0x9b   :  { %1391 = vmatprep.subr.bf16.mxu0 %v2658_v51  ;;  %v2728_v51 = vld [vmem:[#allocation4 + $0x328] ss:$16 sps:$4 sm:$0xff]   ;;  %v2811_v52 = vld [vmem:[#allocation6 + $0x34] ss:$8 sps:$4 sm:$0xff]  }
  0x9d   :  { %1478 = vmatpush1.bf16.msra.mxu1 %v2659_v54  ;;  %v2809_v54 = vld [vmem:[#allocation6 + $0x30] ss:$8 sps:$4 sm:$0xff]  }
  0x9e   :  { %1392 = vmatpush1.bf16.msra.mxu0 %v2656_v53  ;;  %1479 = vmatprep.subr.bf16.mxu1 %v2667_v57  ;;  %v2733_v53 = vld [vmem:[#allocation4 + $0x34c] ss:$16 sps:$4 sm:$0xff]   ;;  %v2731_v57 = vld [vmem:[#allocation4 + $0x348] ss:$16 sps:$4 sm:$0xff]  }
  0x9f   :  { %1393 = vmatprep.subr.bf16.mxu0 %v2664_v56  ;;  %v2814_v56 = vld [vmem:[#allocation6 + $0x44] ss:$8 sps:$4 sm:$0xff]  }
  0xa1   :  { %1480 = vmatpush1.bf16.msra.mxu1 %v2665_v59  ;;  %v2812_v59 = vld [vmem:[#allocation6 + $0x40] ss:$8 sps:$4 sm:$0xff]  }
  0xa2   :  { %1394 = vmatpush1.bf16.msra.mxu0 %v2662_v58  ;;  %1481 = vmatprep.subr.bf16.mxu1 %v2673_v61  ;;  %v2736_v58 = vld [vmem:[#allocation4 + $0x36c] ss:$16 sps:$4 sm:$0xff]   ;;  %v2734_v61 = vld [vmem:[#allocation4 + $0x368] ss:$16 sps:$4 sm:$0xff]  }
  0xa3   :  { %1395 = vmatprep.subr.bf16.mxu0 %v2670_v60  ;;  %v2817_v60 = vld [vmem:[#allocation6 + $0x54] ss:$8 sps:$4 sm:$0xff]  }
  0xa5   :  { %1482 = vmatpush1.bf16.msra.mxu1 %v2671_v63  ;;  %v2815_v63 = vld [vmem:[#allocation6 + $0x50] ss:$8 sps:$4 sm:$0xff]  }
  0xa6   :  { %1396 = vmatpush1.bf16.msra.mxu0 %v2668_v62  ;;  %1483 = vmatprep.subr.bf16.mxu1 %v2679_v1  ;;  %v2739_v62 = vld [vmem:[#allocation4 + $0x38c] ss:$16 sps:$4 sm:$0xff]   ;;  %v2737_v1 = vld [vmem:[#allocation4 + $0x388] ss:$16 sps:$4 sm:$0xff]  }
  0xa7   :  { %1397 = vmatprep.subr.bf16.mxu0 %v2676_v0  ;;  %v2820_v0 = vld [vmem:[#allocation6 + $0x64] ss:$8 sps:$4 sm:$0xff]  }
  0xa9   :  { %1484 = vmatpush1.bf16.msra.mxu1 %v2677_v3  ;;  %v2818_v3 = vld [vmem:[#allocation6 + $0x60] ss:$8 sps:$4 sm:$0xff]  }
  0xaa   :  { %1398 = vmatpush1.bf16.msra.mxu0 %v2674_v2  ;;  %1485 = vmatprep.subr.bf16.mxu1 %v2685_v5  ;;  %v2742_v2 = vld [vmem:[#allocation4 + $0x3ac] ss:$16 sps:$4 sm:$0xff]   ;;  %v2740_v5 = vld [vmem:[#allocation4 + $0x3a8] ss:$16 sps:$4 sm:$0xff]  }
  0xab   :  { %1399 = vmatprep.subr.bf16.mxu0 %v2682_v4  ;;  %v2823_v4 = vld [vmem:[#allocation6 + $0x74] ss:$8 sps:$4 sm:$0xff]  }
  0xad   :  { %1486 = vmatpush1.bf16.msra.mxu1 %v2683_v7  ;;  %v2821_v7 = vld [vmem:[#allocation6 + $0x70] ss:$8 sps:$4 sm:$0xff]  }
  0xae   :  { %1400 = vmatpush1.bf16.msra.mxu0 %v2680_v6  ;;  %1487 = vmatprep.subr.bf16.mxu1 %v2691_v9  ;;  %v2745_v6 = vld [vmem:[#allocation4 + $0x3cc] ss:$16 sps:$4 sm:$0xff]   ;;  %v2743_v9 = vld [vmem:[#allocation4 + $0x3c8] ss:$16 sps:$4 sm:$0xff]  }
  0xaf   :  { %1401 = vmatprep.subr.bf16.mxu0 %v2688_v8  ;;  %v2826_v8 = vld [vmem:[#allocation6 + $0x84] ss:$8 sps:$4 sm:$0xff]  }
  0xb1   :  { %1488 = vmatpush1.bf16.msra.mxu1 %v2689_v11  ;;  %v2824_v11 = vld [vmem:[#allocation6 + $0x80] ss:$8 sps:$4 sm:$0xff]  }
  0xb2   :  { %1402 = vmatpush1.bf16.msra.mxu0 %v2686_v10  ;;  %1489 = vmatprep.subr.bf16.mxu1 %v2697_v14  ;;  %v2748_v10 = vld [vmem:[#allocation4 + $0x3ec] ss:$16 sps:$4 sm:$0xff]   ;;  %v2746_v14 = vld [vmem:[#allocation4 + $0x3e8] ss:$16 sps:$4 sm:$0xff]  }
  0xb3   :  { %1403 = vmatprep.subr.bf16.mxu0 %v2694_v13  ;;  %v2829_v13 = vld [vmem:[#allocation6 + $0x94] ss:$8 sps:$4 sm:$0xff]  }
  0xb5   :  { %1490 = vmatpush1.bf16.msra.mxu1 %v2695_v17  ;;  %v2827_v17 = vld [vmem:[#allocation6 + $0x90] ss:$8 sps:$4 sm:$0xff]  }
  0xb6   :  { %1404 = vmatpush1.bf16.msra.mxu0 %v2692_v16  ;;  %1502 = vmatprep.subr.bf16.mxu1 %v2700_v20  ;;  %v2751_v16 = vld [vmem:[#allocation4 + $0x40c] ss:$16 sps:$4 sm:$0xff]  }
  0xb7   :  { %1416 = vmatprep.subr.bf16.mxu0 %v2706_v21  ;;  %v2754_v20 = vld [vmem:[#allocation4 + $0x42c] ss:$16 sps:$4 sm:$0xff]   ;;  %v2830_v21 = vld [vmem:[#allocation6 + $0xa0] ss:$8 sps:$4 sm:$0xff]  }
  0xb8   :  { %1492 = vmatmul.mubr.bf16.vlgmr.msra.gmra.mrb[4].mxu1 %v3056_v12  ;;  %v2715_v12 = vld [vmem:[#allocation4 + $0x28c] ss:$16 sps:$4 sm:$0xff]  }
  0xb9   :  { %1406 = vmatmul.mubr.bf16.vlgmr.msra.gmra.mrb[0].mxu0 %v3066_v22  ;;  %1503 = vmatpush1.bf16.msra.mxu1 %v2698_v23  ;;  %v2835_v23 = vld [vmem:[#allocation6 + $0xb4] ss:$8 sps:$4 sm:$0xff]  }
  0xba   :  { %1417 = vmatpush1.bf16.msra.mxu0 %v2704_v24  ;;  %1504 = vmatprep.subr.bf16.mxu1 %v2703_v25  ;;  %v2752_v24 = vld [vmem:[#allocation4 + $0x428] ss:$16 sps:$4 sm:$0xff]   ;;  %v2757_v25 = vld [vmem:[#allocation4 + $0x44c] ss:$16 sps:$4 sm:$0xff]  }
  0xbb   :  { %1448 = vmatprep.mubr.bf16.mxu0 %v2983_v28  ;;  %1534 = vmatprep.mubr.bf16.mxu1 %v3052_v55  ;;  %v2719_v55 = vld [vmem:[#allocation4 + $0x2c8] ss:$16 sps:$4 sm:$0xff]  }
  0xbc   :  { %2046 = vmatprep.subr.bf16.mxu0 %v2802_v41  ;;  %v2841_v41 = vld [vmem:[#allocation6 + $0xd4] ss:$8 sps:$4 sm:$0xff]  }
  0xbd   :  { %1505 = vmatpush1.bf16.msra.mxu1 %v2701_v26  ;;  %v2833_v26 = vld [vmem:[#allocation6 + $0xb0] ss:$8 sps:$4 sm:$0xff]  }
  0xbe   :  { %1506 = vmatprep.subr.bf16.mxu1 %v2709_v27  ;;  %v2838_v27 = vld [vmem:[#allocation6 + $0xc4] ss:$8 sps:$4 sm:$0xff]  }
  0xc1   :  { %1507 = vmatpush1.bf16.msra.mxu1 %v2707_v29  ;;  %v2755_v29 = vld [vmem:[#allocation4 + $0x448] ss:$16 sps:$4 sm:$0xff]  }
  0xc2   :  { %1508 = vmatprep.subr.bf16.mxu1 %v2712_v32  ;;  %v2758_v32 = vld [vmem:[#allocation4 + $0x468] ss:$16 sps:$4 sm:$0xff]  }
  0xc5   :  { %2387 = vmatmul.mubr.msk.bf16.vlgmr.msra.gmra.mrb[0].mxu0 %vm1283_vm0, %v3072_v34  ;;  %1509 = vmatpush1.bf16.msra.mxu1 %v2710_v33  ;;  %v2766_v33 = vld [vmem:[#allocation4 + $0x4ac] ss:$16 sps:$4 sm:$0xff]  }
  0xc6   :  { %1510 = vmatprep.subr.bf16.mxu1 %v2715_v12  ;;  %2047 = vmatpush1.bf16.msra.mxu0 %v2800_v40  ;;  %v2764_v12 = vld [vmem:[#allocation4 + $0x4a8] ss:$16 sps:$4 sm:$0xff]   ;;  %v2778_v40 = vld [vmem:[#allocation4 + $0x52c] ss:$16 sps:$4 sm:$0xff]  }
  0xc7   :  { %2048 = vmatprep.subr.bf16.mxu0 %v2805_v42  ;;  %v2839_v42 = vld [vmem:[#allocation6 + $0xd0] ss:$8 sps:$4 sm:$0xff]  }
  0xc9   :  { %1511 = vmatpush1.bf16.msra.mxu1 %v2713_v35  ;;  %v2769_v35 = vld [vmem:[#allocation4 + $0x4cc] ss:$16 sps:$4 sm:$0xff]  }
  0xca   :  { %1512 = vmatprep.subr.bf16.mxu1 %v2718_v36  ;;  %2049 = vmatpush1.bf16.msra.mxu0 %v2803_v46  ;;  %v2767_v36 = vld [vmem:[#allocation4 + $0x4c8] ss:$16 sps:$4 sm:$0xff]   ;;  %v2844_v46 = vld [vmem:[#allocation6 + $0xe4] ss:$8 sps:$4 sm:$0xff]  }
  0xcb   :  { %2050 = vmatprep.subr.bf16.mxu0 %v2808_v47  ;;  %v2842_v47 = vld [vmem:[#allocation6 + $0xe0] ss:$8 sps:$4 sm:$0xff]  }
  0xcd   :  { %1513 = vmatpush1.bf16.msra.mxu1 %v2716_v37  ;;  %v2772_v37 = vld [vmem:[#allocation4 + $0x4ec] ss:$16 sps:$4 sm:$0xff]  }
  0xce   :  { %1514 = vmatprep.subr.bf16.mxu1 %v2721_v38  ;;  %2051 = vmatpush1.bf16.msra.mxu0 %v2806_v50  ;;  %v2770_v38 = vld [vmem:[#allocation4 + $0x4e8] ss:$16 sps:$4 sm:$0xff]   ;;  %v2847_v50 = vld [vmem:[#allocation6 + $0xf4] ss:$8 sps:$4 sm:$0xff]  }
  0xcf   :  { %2052 = vmatprep.subr.bf16.mxu0 %v2811_v52  ;;  %v2782_v52 = vld [vmem:[#allocation4 + $0x568] ss:$16 sps:$4 sm:$0xff]  }
  0xd1   :  { %1515 = vmatpush1.bf16.msra.mxu1 %v2719_v55  ;;  %v2775_v55 = vld [vmem:[#allocation4 + $0x50c] ss:$16 sps:$4 sm:$0xff]  }
  0xd2   :  { %1516 = vmatprep.subr.bf16.mxu1 %v2724_v39  ;;  %2053 = vmatpush1.bf16.msra.mxu0 %v2809_v54  ;;  %v2773_v39 = vld [vmem:[#allocation4 + $0x508] ss:$16 sps:$4 sm:$0xff]   ;;  %v2850_v54 = vld [vmem:[#allocation6 + $0x104] ss:$8 sps:$4 sm:$0xff]  }
  0xd3   :  { %2054 = vmatprep.subr.bf16.mxu0 %v2814_v56  ;;  %v2785_v56 = vld [vmem:[#allocation4 + $0x588] ss:$16 sps:$4 sm:$0xff]  }
  0xd5   :  { %1517 = vmatpush1.bf16.msra.mxu1 %v2722_v43  ;;  %v2776_v43 = vld [vmem:[#allocation4 + $0x528] ss:$16 sps:$4 sm:$0xff]  }
  0xd6   :  { %1518 = vmatprep.subr.bf16.mxu1 %v2727_v45  ;;  %2055 = vmatpush1.bf16.msra.mxu0 %v2812_v59  ;;  %v2781_v45 = vld [vmem:[#allocation4 + $0x54c] ss:$16 sps:$4 sm:$0xff]  }
  0xd7   :  { %2056 = vmatprep.subr.bf16.mxu0 %v2817_v60  ;;  %v2793_v59 = vld [vmem:[#allocation4 + $0x5cc] ss:$16 sps:$4 sm:$0xff]   ;;  %v2791_v60 = vld [vmem:[#allocation4 + $0x5c8] ss:$16 sps:$4 sm:$0xff]  }
  0xd9   :  { %1519 = vmatpush1.bf16.msra.mxu1 %v2725_v48  ;;  %v2779_v48 = vld [vmem:[#allocation4 + $0x548] ss:$16 sps:$4 sm:$0xff]  }
  0xda   :  { %1520 = vmatprep.subr.bf16.mxu1 %v2730_v49  ;;  %2057 = vmatpush1.bf16.msra.mxu0 %v2815_v63  ;;  %v2784_v49 = vld [vmem:[#allocation4 + $0x56c] ss:$16 sps:$4 sm:$0xff]  }
  0xdb   :  { %2058 = vmatprep.subr.bf16.mxu0 %v2820_v0  ;;  %v2799_v63 = vld [vmem:[#allocation4 + $0x60c] ss:$16 sps:$4 sm:$0xff]   ;;  %v2797_v0 = vld [vmem:[#allocation4 + $0x608] ss:$16 sps:$4 sm:$0xff]  }
  0xdd   :  { %1521 = vmatpush1.bf16.msra.mxu1 %v2728_v51  ;;  %v2845_v51 = vld [vmem:[#allocation6 + $0xf0] ss:$8 sps:$4 sm:$0xff]  }
  0xde   :  { %1522 = vmatprep.subr.bf16.mxu1 %v2733_v53  ;;  %2059 = vmatpush1.bf16.msra.mxu0 %v2818_v3  ;;  %v2787_v53 = vld [vmem:[#allocation4 + $0x58c] ss:$16 sps:$4 sm:$0xff]  }
  0xdf   :  { %2060 = vmatprep.subr.bf16.mxu0 %v2823_v4 }
  0xe1   :  { %1523 = vmatpush1.bf16.msra.mxu1 %v2731_v57  ;;  %v2790_v57 = vld [vmem:[#allocation4 + $0x5ac] ss:$16 sps:$4 sm:$0xff]  }
  0xe2   :  { %1524 = vmatprep.subr.bf16.mxu1 %v2736_v58  ;;  %2061 = vmatpush1.bf16.msra.mxu0 %v2821_v7  ;;  %v2788_v58 = vld [vmem:[#allocation4 + $0x5a8] ss:$16 sps:$4 sm:$0xff]  }
  0xe3   :  { %2062 = vmatprep.subr.bf16.mxu0 %v2826_v8 }
  0xe5   :  { %1525 = vmatpush1.bf16.msra.mxu1 %v2734_v61  ;;  %v2796_v61 = vld [vmem:[#allocation4 + $0x5ec] ss:$16 sps:$4 sm:$0xff]  }
  0xe6   :  { %1526 = vmatprep.subr.bf16.mxu1 %v2739_v62  ;;  %2063 = vmatpush1.bf16.msra.mxu0 %v2824_v11  ;;  %v2794_v62 = vld [vmem:[#allocation4 + $0x5e8] ss:$16 sps:$4 sm:$0xff]  }
  0xe7   :  { %2064 = vmatprep.subr.bf16.mxu0 %v2829_v13 }
  0xe9   :  { %1527 = vmatpush1.bf16.msra.mxu1 %v2737_v1 }
  0xea   :  { %1528 = vmatprep.subr.bf16.mxu1 %v2742_v2  ;;  %2065 = vmatpush1.bf16.msra.mxu0 %v2827_v17 }
  0xeb   :  { %2066 = vmatprep.subr.bf16.mxu0 %v2832_v18 }
  0xed   :  { %1529 = vmatpush1.bf16.msra.mxu1 %v2740_v5  ;;  %v283_v5 = vlaneseq }
  0xee   :  { %1530 = vmatprep.subr.bf16.mxu1 %v2745_v6  ;;  %2067 = vmatpush1.bf16.msra.mxu0 %v2830_v21 }
  0xef   :  { %2068 = vmatprep.subr.bf16.mxu0 %v2835_v23  ;;  %v3082_v6 = vshrl.u32 %v283_v5, 7 }
  0xf1   :  { %1531 = vmatpush1.bf16.msra.mxu1 %v2743_v9  ;;  %v3085_v7 = vsub.s32 0, %v3082_v6 }
  0xf2   :  { %1532 = vmatprep.subr.bf16.mxu1 %v2748_v10  ;;  %2069 = vmatpush1.bf16.msra.mxu0 %v2833_v26 }
  0xf3   :  { %2070 = vmatprep.subr.bf16.mxu0 %v2838_v27 }
  0xf5   :  { %1533 = vmatpush1.bf16.msra.mxu1 %v2746_v14 }
  0xf6   :  { %1545 = vmatprep.subr.bf16.mxu1 %v2751_v16  ;;  %2071 = vmatpush1.bf16.msra.mxu0 %v2836_v31 }
  0xf7   :  { %2072 = vmatprep.subr.bf16.mxu0 %v2841_v41  ;;  %v2865_v41 = vld [vmem:[#allocation6 + $0x154] ss:$8 sps:$4 sm:$0xff]  }
  0xf8   :  { %1535 = vmatmul.mubr.bf16.vlgmr.msra.gmra.mrb[4].mxu1 %v3058_v15  ;;  %v2763_v15 = vld [vmem:[#allocation4 + $0x48c] ss:$16 sps:$4 sm:$0xff]  }
  0xf9   :  { %1546 = vmatpush1.bf16.msra.mxu1 %v2749_v19  ;;  %1577 = vmatprep.mubr.bf16.mxu1 %v3063_v44  ;;  %v2761_v44 = vld [vmem:[#allocation4 + $0x488] ss:$16 sps:$4 sm:$0xff]  }
  0xfa   :  { %1547 = vmatprep.subr.bf16.mxu1 %v2754_v20  ;;  %2073 = vmatpush1.bf16.msra.mxu0 %v2839_v42  ;;  %v2863_v42 = vld [vmem:[#allocation6 + $0x150] ss:$8 sps:$4 sm:$0xff]  }
  0xfb   :  { %2074 = vmatprep.subr.bf16.mxu0 %v2844_v46  ;;  %v2871_v46 = vld [vmem:[#allocation6 + $0x174] ss:$8 sps:$4 sm:$0xff]  }
  0xfd   :  { %1548 = vmatpush1.bf16.msra.mxu1 %v2752_v24 }
  0xfe   :  { %1549 = vmatprep.subr.bf16.mxu1 %v2757_v25  ;;  %2075 = vmatpush1.bf16.msra.mxu0 %v2842_v47  ;;  %v2869_v47 = vld [vmem:[#allocation6 + $0x170] ss:$8 sps:$4 sm:$0xff]  }
  0xff   :  { %2076 = vmatprep.subr.bf16.mxu0 %v2847_v50  ;;  %v2877_v50 = vld [vmem:[#allocation6 + $0x194] ss:$8 sps:$4 sm:$0xff]  }
 0x101   :  { %1550 = vmatpush1.bf16.msra.mxu1 %v2755_v29 }
 0x102   :  { %1551 = vmatprep.subr.bf16.mxu1 %v2760_v30  ;;  %2077 = vmatpush1.bf16.msra.mxu0 %v2845_v51  ;;  %v2875_v51 = vld [vmem:[#allocation6 + $0x190] ss:$8 sps:$4 sm:$0xff]  }
 0x103   :  { %2089 = vmatprep.subr.bf16.mxu0 %v2850_v54  ;;  %v2883_v54 = vld [vmem:[#allocation6 + $0x1b4] ss:$8 sps:$4 sm:$0xff]  }
 0x105   :  { %1552 = vmatpush1.bf16.msra.mxu1 %v2758_v32 }
 0x106   :  { %1553 = vmatprep.subr.bf16.mxu1 %v2763_v15 }
 0x109   :  { %1554 = vmatpush1.bf16.msra.mxu1 %v2761_v44 }
 0x10a   :  { %1555 = vmatprep.subr.bf16.mxu1 %v2766_v33  ;;  %v2848_v33 = vld [vmem:[#allocation6 + $0x100] ss:$8 sps:$4 sm:$0xff]  }
 0x10d   :  { %1556 = vmatpush1.bf16.msra.mxu1 %v2764_v12  ;;  %v2853_v12 = vld [vmem:[#allocation6 + $0x114] ss:$8 sps:$4 sm:$0xff]  }
 0x10e   :  { %1557 = vmatprep.subr.bf16.mxu1 %v2769_v35  ;;  %v2851_v35 = vld [vmem:[#allocation6 + $0x110] ss:$8 sps:$4 sm:$0xff]  }
 0x111   :  { %1558 = vmatpush1.bf16.msra.mxu1 %v2767_v36  ;;  %v2856_v36 = vld [vmem:[#allocation6 + $0x124] ss:$8 sps:$4 sm:$0xff]  }
 0x112   :  { %1559 = vmatprep.subr.bf16.mxu1 %v2772_v37  ;;  %v2854_v37 = vld [vmem:[#allocation6 + $0x120] ss:$8 sps:$4 sm:$0xff]  }
 0x115   :  { %1560 = vmatpush1.bf16.msra.mxu1 %v2770_v38  ;;  %v2859_v38 = vld [vmem:[#allocation6 + $0x134] ss:$8 sps:$4 sm:$0xff]  }
 0x116   :  { %1561 = vmatprep.subr.bf16.mxu1 %v2775_v55  ;;  %v2857_v55 = vld [vmem:[#allocation6 + $0x130] ss:$8 sps:$4 sm:$0xff]  }
 0x119   :  { %1562 = vmatpush1.bf16.msra.mxu1 %v2773_v39  ;;  %v2862_v39 = vld [vmem:[#allocation6 + $0x144] ss:$8 sps:$4 sm:$0xff]  }
 0x11a   :  { %1563 = vmatprep.subr.bf16.mxu1 %v2778_v40  ;;  %v2860_v40 = vld [vmem:[#allocation6 + $0x140] ss:$8 sps:$4 sm:$0xff]  }
 0x11d   :  { %1564 = vmatpush1.bf16.msra.mxu1 %v2776_v43  ;;  %v2868_v43 = vld [vmem:[#allocation6 + $0x164] ss:$8 sps:$4 sm:$0xff]  }
 0x11e   :  { %1565 = vmatprep.subr.bf16.mxu1 %v2781_v45  ;;  %v2866_v45 = vld [vmem:[#allocation6 + $0x160] ss:$8 sps:$4 sm:$0xff]  }
 0x121   :  { %1566 = vmatpush1.bf16.msra.mxu1 %v2779_v48  ;;  %v2874_v48 = vld [vmem:[#allocation6 + $0x184] ss:$8 sps:$4 sm:$0xff]  }
 0x122   :  { %1567 = vmatprep.subr.bf16.mxu1 %v2784_v49  ;;  %v2872_v49 = vld [vmem:[#allocation6 + $0x180] ss:$8 sps:$4 sm:$0xff]  }
 0x125   :  { %1568 = vmatpush1.bf16.msra.mxu1 %v2782_v52  ;;  %v2880_v52 = vld [vmem:[#allocation6 + $0x1a4] ss:$8 sps:$4 sm:$0xff]  }
 0x126   :  { %1569 = vmatprep.subr.bf16.mxu1 %v2787_v53  ;;  %v2878_v53 = vld [vmem:[#allocation6 + $0x1a0] ss:$8 sps:$4 sm:$0xff]  }
 0x129   :  { %1570 = vmatpush1.bf16.msra.mxu1 %v2785_v56  ;;  %v2881_v56 = vld [vmem:[#allocation6 + $0x1b0] ss:$8 sps:$4 sm:$0xff]  }
 0x12a   :  { %1571 = vmatprep.subr.bf16.mxu1 %v2790_v57  ;;  %v2886_v57 = vld [vmem:[#allocation6 + $0x1c4] ss:$8 sps:$4 sm:$0xff]  }
 0x12d   :  { %1572 = vmatpush1.bf16.msra.mxu1 %v2788_v58  ;;  %v2884_v58 = vld [vmem:[#allocation6 + $0x1c0] ss:$8 sps:$4 sm:$0xff]  }
 0x12e   :  { %1573 = vmatprep.subr.bf16.mxu1 %v2793_v59  ;;  %v2889_v59 = vld [vmem:[#allocation6 + $0x1d4] ss:$8 sps:$4 sm:$0xff]  }
 0x131   :  { %1574 = vmatpush1.bf16.msra.mxu1 %v2791_v60  ;;  %v2887_v60 = vld [vmem:[#allocation6 + $0x1d0] ss:$8 sps:$4 sm:$0xff]  }
 0x132   :  { %1575 = vmatprep.subr.bf16.mxu1 %v2796_v61  ;;  %v2892_v61 = vld [vmem:[#allocation6 + $0x1e4] ss:$8 sps:$4 sm:$0xff]  }
 0x135   :  { %1576 = vmatpush1.bf16.msra.mxu1 %v2794_v62  ;;  %v2890_v62 = vld [vmem:[#allocation6 + $0x1e0] ss:$8 sps:$4 sm:$0xff]  }
 0x136   :  { %1588 = vmatprep.subr.bf16.mxu1 %v2799_v63  ;;  %v2895_v63 = vld [vmem:[#allocation6 + $0x1f4] ss:$8 sps:$4 sm:$0xff]  }
 0x138   :  { %1578 = vmatmul.mubr.bf16.vlgmr.msra.gmra.mrb[4].mxu1 %v3066_v22  ;;  %v3090_v22 = vld [vmem:[%s3126_s4] sm:$0xf] }
 0x139   :  { %1589 = vmatpush1.bf16.msra.mxu1 %v2797_v0  ;;  %1620 = vmatprep.mubr.bf16.mxu1 %v2983_v28  ;;  %v3093_v28 = vsub.s32 1, %v3082_v6  ;;  %v2893_v0 = vld [vmem:[#allocation6 + $0x1f0] ss:$8 sps:$4 sm:$0xff]  }
 0x13b   :  { %v290_v8 = vrot.slane %v3090_v22, %v3093_v28 }
 0x144   :  { %2388 = vmatmul.mubr.msk.bf16.vlgmr.msra.gmra.mrb[4].mxu1 %vm1283_vm0, %v3072_v34  ;;  %v286_v34 = vrot.slane %v3090_v22, %v3085_v7 }
 0x14b   :  { %v1321_v1 = vpop.f32.mrb[0].mxu1 }
 0x14c   :  { %v1323_v2 = vpop.f32.mrb[1].mxu1  ;;  %v1322_v9 = vadd.f32 %v1321_v1, %v286_v34  ;;  %v293_v1 = vsub.s32 2, %v3082_v6 }
 0x14d   :  { %v1325_v3 = vpop.f32.mrb[2].mxu1  ;;  %v1324_v10 = vadd.f32 %v1323_v2, %v290_v8  ;;  %v297_v2 = vsub.s32 3, %v3082_v6 }
 0x14e   :  { %v1327_v4 = vpop.f32.mrb[3].mxu1  ;;  %v1326_v13 = vadd.f32 %v1325_v3, %v286_v34  ;;  %v294_v3 = vrot.slane %v3090_v22, %v293_v1 }
 0x14f   :  { %v1328_v17 = vadd.f32 %v1327_v4, %v290_v8  ;;  %v298_v4 = vrot.slane %v3090_v22, %v297_v2  ;;  %v63_v22 = vld [vmem:[%s3126_s4 + $0x4] sm:$0x3] }
 0x198   :  { %v1450_v11 = vpop.f32.mrb[0].mxu0 }
 0x199   :  { %v2457_v14 = vadd.f32 %v1450_v11, %v1322_v9  ;;  %v1452_v16 = vpop.f32.mrb[1].mxu0 }
 0x19a   :  { %v2459_v18 = vadd.f32 %v1452_v16, %v1324_v10  ;;  %v1454_v19 = vpop.f32.mrb[2].mxu0 }
 0x19b   :  { %v1631_v20 = vmul.f32 0.2, %v2457_v14  ;;  %v2461_v21 = vadd.f32 %v1454_v19, %v1326_v13  ;;  %v1456_v23 = vpop.f32.mrb[3].mxu0 }
 0x19c   :  { %v1632_v24 = vmul.f32 0.2, %v2459_v18  ;;  %v2463_v25 = vadd.f32 %v1456_v23, %v1328_v17 }
 0x19d   :  { %v1635_v26 = vmul.f32 0.2, %v2461_v21  ;;  %v1639_v29 = vmax.f32 %v2457_v14, %v1631_v20 }
 0x19e   :  { %v1636_v27 = vmul.f32 0.2, %v2463_v25  ;;  %v1640_v31 = vmax.f32 %v2459_v18, %v1632_v24 }
 0x19f   :  { %v1643_v30 = vmax.f32 %v2461_v21, %v1635_v26  ;;  %v1719_v26 = vrot.slane %v63_v22, %v3085_v7 }
 0x1a0   :  { %v1644_v32 = vmax.f32 %v2463_v25, %v1636_v27  ;;  %v1723_v27 = vrot.slane %v63_v22, %v3093_v28 }
 0x1a1   :  { %v1647_v15 = vpack.c.bf16 %v1643_v30, %v1639_v29  ;;  %v2140_v30 = vld [vmem:[%s3125_s3] sm:$0x3] }
 0x1a2   :  { %v1648_v44 = vpack.c.bf16 %v1644_v32, %v1640_v31 }
 0x1a4   :  { %2078 = vmatprep.mubr.bf16.mxu0 %v1648_v44 }
 0x1a5   :  { %2079 = vmatmul.mubr.bf16.vlgmr.msra.gmra.mrb[4].mxu0 %v1647_v15 }
 0x1a6   :  { %2090 = vmatpush1.bf16.msra.mxu0 %v2848_v33 }
 0x1a7   :  { %2091 = vmatprep.subr.bf16.mxu0 %v2853_v12 }
 0x1aa   :  { %2092 = vmatpush1.bf16.msra.mxu0 %v2851_v35 }
 0x1ab   :  { %2093 = vmatprep.subr.bf16.mxu0 %v2856_v36  ;;  %v2145_v36 = vrot.slane %v2140_v30, %v3085_v7  ;;  %v2453_v7 = vld [vmem:[%s3126_s4 + $0x6] ss:$0 sm:$0xff] }
 0x1ae   :  { %2094 = vmatpush1.bf16.msra.mxu0 %v2854_v37 }
 0x1af   :  { %2095 = vmatprep.subr.bf16.mxu0 %v2859_v38 }
 0x1b2   :  { %2096 = vmatpush1.bf16.msra.mxu0 %v2857_v55  ;;  %v2149_v55 = vrot.slane %v2140_v30, %v3093_v28 }
 0x1b3   :  { %2097 = vmatprep.subr.bf16.mxu0 %v2862_v39 }
 0x1b6   :  { %2098 = vmatpush1.bf16.msra.mxu0 %v2860_v40 }
 0x1b7   :  { %2099 = vmatprep.subr.bf16.mxu0 %v2865_v41 }
 0x1ba   :  { %2100 = vmatpush1.bf16.msra.mxu0 %v2863_v42 }
 0x1bb   :  { %2101 = vmatprep.subr.bf16.mxu0 %v2868_v43 }
 0x1be   :  { %2102 = vmatpush1.bf16.msra.mxu0 %v2866_v45 }
 0x1bf   :  { %2103 = vmatprep.subr.bf16.mxu0 %v2871_v46 }
 0x1c2   :  { %2104 = vmatpush1.bf16.msra.mxu0 %v2869_v47 }
 0x1c3   :  { %2105 = vmatprep.subr.bf16.mxu0 %v2874_v48 }
 0x1c6   :  { %2106 = vmatpush1.bf16.msra.mxu0 %v2872_v49 }
 0x1c7   :  { %2107 = vmatprep.subr.bf16.mxu0 %v2877_v50 }
 0x1ca   :  { %2108 = vmatpush1.bf16.msra.mxu0 %v2875_v51 }
 0x1cb   :  { %2109 = vmatprep.subr.bf16.mxu0 %v2880_v52 }
 0x1ce   :  { %2110 = vmatpush1.bf16.msra.mxu0 %v2878_v53 }
 0x1cf   :  { %2111 = vmatprep.subr.bf16.mxu0 %v2883_v54 }
 0x1d2   :  { %2112 = vmatpush1.bf16.msra.mxu0 %v2881_v56 }
 0x1d3   :  { %2113 = vmatprep.subr.bf16.mxu0 %v2886_v57 }
 0x1d6   :  { %2114 = vmatpush1.bf16.msra.mxu0 %v2884_v58 }
 0x1d7   :  { %2115 = vmatprep.subr.bf16.mxu0 %v2889_v59 }
 0x1da   :  { %2116 = vmatpush1.bf16.msra.mxu0 %v2887_v60 }
 0x1db   :  { %2117 = vmatprep.subr.bf16.mxu0 %v2892_v61 }
 0x1de   :  { %2118 = vmatpush1.bf16.msra.mxu0 %v2890_v62 }
 0x1df   :  { %2119 = vmatprep.subr.bf16.mxu0 %v2895_v63 }
 0x1e2   :  { %2120 = vmatpush1.bf16.msra.mxu0 %v2893_v0 }
 0x217   :  { %v1622_v5 = vpop.f32.mrb[4].mxu1 }
 0x218   :  { %v2464_v34 = vadd.f32 %v1622_v5, %v294_v3  ;;  %v1624_v8 = vpop.f32.mrb[5].mxu1 }
 0x219   :  { %v2465_v9 = vadd.f32 %v1624_v8, %v298_v4  ;;  %v1626_v10 = vpop.f32.mrb[6].mxu1 }
 0x21a   :  { %v1633_v11 = vmul.f32 0.2, %v2464_v34  ;;  %v2466_v13 = vadd.f32 %v1626_v10, %v294_v3  ;;  %v1628_v14 = vpop.f32.mrb[7].mxu1 }
 0x21b   :  { %v1634_v16 = vmul.f32 0.2, %v2465_v9  ;;  %v2467_v17 = vadd.f32 %v1628_v14, %v298_v4 }
 0x21c   :  { %v1637_v18 = vmul.f32 0.2, %v2466_v13  ;;  %v1641_v20 = vmax.f32 %v2464_v34, %v1633_v11 }
 0x21d   :  { %v1638_v19 = vmul.f32 0.2, %v2467_v17  ;;  %v1642_v23 = vmax.f32 %v2465_v9, %v1634_v16 }
 0x21e   :  { %v1645_v21 = vmax.f32 %v2466_v13, %v1637_v18 }
 0x21f   :  { %v1646_v6 = vmax.f32 %v2467_v17, %v1638_v19 }
 0x220   :  { %v1649_v24 = vpack.c.bf16 %v1645_v21, %v1641_v20 }
 0x221   :  { %v1650_v25 = vpack.c.bf16 %v1646_v6, %v1642_v23 }
 0x223   :  { %2121 = vmatprep.mubr.bf16.mxu0 %v1650_v25 }
 0x224   :  { %2122 = vmatmul.mubr.bf16.vlgmr.msra.gmra.mrb[4].mxu0 %v1649_v24 }
 0x2f7   :  { %v2123_v29 = vpop.f32.mrb[4].mxu0 }
 0x2f8   :  { %v2468_v31 = vadd.f32 %v2123_v29, %v1719_v26  ;;  %v2125_v32 = vpop.f32.mrb[5].mxu0 }
 0x2f9   :  { %v2469_v15 = vadd.f32 %v2125_v32, %v1723_v27  ;;  %v2127_v44 = vpop.f32.mrb[6].mxu0 }
 0x2fa   :  { %v2132_v33 = vmul.f32 0.2, %v2468_v31  ;;  %v2470_v12 = vadd.f32 %v2127_v44, %v1719_v26  ;;  %v2129_v35 = vpop.f32.mrb[7].mxu0 }
 0x2fb   :  { %v2133_v37 = vmul.f32 0.2, %v2469_v15  ;;  %v2471_v38 = vadd.f32 %v2129_v35, %v1723_v27 }
 0x2fc   :  { %v2136_v39 = vmax.f32 %v2468_v31, %v2132_v33  ;;  %v2134_v40 = vmul.f32 0.2, %v2470_v12 }
 0x2fd   :  { %v2137_v41 = vmax.f32 %v2469_v15, %v2133_v37  ;;  %v2135_v42 = vmul.f32 0.2, %v2471_v38 }
 0x2fe   :  { %v2138_v43 = vmax.f32 %v2470_v12, %v2134_v40  ;;  %v2152_v45 = vmul.f32 %v2145_v36, %v2136_v39 }
 0x2ff   :  { %v2139_v46 = vmax.f32 %v2471_v38, %v2135_v42  ;;  %v2153_v47 = vmul.f32 %v2149_v55, %v2137_v41 }
 0x300   :  { %v2154_v48 = vmul.f32 %v2145_v36, %v2138_v43 }
 0x301   :  { %v2156_v49 = vadd.f32 %v2153_v47, %v2152_v45  ;;  %v2155_v50 = vmul.f32 %v2149_v55, %v2139_v46 }
 0x303   :  { %2157 = vadd.xlane.f32.xlu0 %v2156_v49  ;;  %v2159_v51 = vadd.f32 %v2155_v50, %v2154_v48 }
 0x307   :  { %2160 = vadd.xlane.f32.xlu0 %v2159_v51 }
 0x390   :  { %v2158_v52 = vpop.xlane.xlu0 %2157 }
 0x391   :  { %v2168_v28 = vadd.f32 %v2453_v7, %v2158_v52 }
 0x393   :  { %v2454_v53 = vmul.f32 -1.442695, %v2168_v28 }
 0x394   :  { %v2161_v54 = vpop.xlane.xlu0 %2160 }
 0x395   :  { %2896 = vpow2.f32 %v2454_v53  ;;  %v2169_v56 = vadd.f32 %v2453_v7, %v2161_v54 }
 0x397   :  { %v2455_v57 = vmul.f32 -1.442695, %v2169_v56 }
 0x399   :  { %2898 = vpow2.f32 %v2455_v57 }
 0x39f   :  { %v2897_v58 = vpop.eup %2896 }
 0x3a0   :  { %v2176_v59 = vadd.f32 1.0, %v2897_v58 }
 0x3a2   :  { %2900 = vrcp.f32 %v2176_v59 }
 0x3a3   :  { %v2899_v60 = vpop.eup %2898 }
 0x3a4   :  { %v2177_v61 = vadd.f32 1.0, %v2899_v60 }
 0x3a6   :  { %2902 = vrcp.f32 %v2177_v61 }
 0x3ac   :  { %v2901_v62 = vpop.eup %2900 }
 0x3ad   :  { %2183 = vst.msk [vmem:[%s3127_s5] sm:$0xff] %vm2182_vm1, %v2901_v62 }
 0x3b0   :  { %v2903_v63 = vpop.eup %2902 }
 0x3b1   :  { %2184 = vst.msk [vmem:[%s3127_s5 + $0x8] sm:$0xff] %vm2182_vm1, %v2903_v63 }
 0x3b2   :  { %2189 = vsyncpa [#allocation3], 1 }
 0x3b3   :  { %2190 = vsyncpa [#allocation5], 1 }

</bundles_post_ra>
